<compile_context>
chip_gen: v5e
topology: v5e:2x2
jax: 0.10.0
libtpu: 0.0.40
codegen_flags: <defaults>
</compile_context>

<pallas_src>
import math

import jax
import jax.numpy as jnp
import numpy as np
from jax.experimental import pallas as pl
from jax.experimental.pallas import tpu as pltpu

# ----- hyperparameters (match the module's __init__ contract) -----
WIDTH = 16
NUM_FILTERS = 8
FILTER_SIZE = 5
POOL_SIZE = 2
HIDDEN = {"first": 32, "second": 16}
IN_CHANNELS = 5

CONV_LEN = WIDTH - FILTER_SIZE + 1                                   # valid Conv1d length = 12
POOL_OUT = CONV_LEN // POOL_SIZE                                     # MaxPool1d (floor)  = 6
FLAT = math.ceil((WIDTH - FILTER_SIZE) / POOL_SIZE) * NUM_FILTERS    # fc1 in_features    = 48
assert FLAT == POOL_OUT * NUM_FILTERS, "chosen shapes must make fc1 input size consistent"

H1 = HIDDEN["first"]                     # 32
H2 = HIDDEN["second"]                    # 16
CW = IN_CHANNELS * WIDTH                 # 80 features per flattened input sample
M_ROWS = POOL_SIZE * FLAT                # 96 conv rows (both pool offsets stacked)


def _round8(n):
    return (n + 7) // 8 * 8


# ----- param-slab layout (all sublane offsets are multiples of 8) -----
M_OFF = 0                                # (M_ROWS, CW) folded conv weight matrix
W1_OFF = M_OFF + M_ROWS                  # 96   (H1, FLAT)
W2_OFF = W1_OFF + H1                     # 128  (H2, H1)
W3_OFF = W2_OFF + H2                     # 144  (1,  H2)
BC_OFF = _round8(W3_OFF + 1)             # 152  (FLAT, 1) conv bias repeated per pooled position
B1_OFF = BC_OFF + FLAT                   # 200  (H1, 1)
B2_OFF = B1_OFF + H1                     # 232  (H2, 1)
B3_OFF = B2_OFF + H2                     # 248  (1, 1)
PARAM_ROWS = _round8(B3_OFF + 1)         # 256
PARAM_COLS = CW                          # 80

BATCH_TILE = 128                         # lane width per grid step (bump to 512+ for huge batches on v6e)


# ---------------------------------------------------------------------------
# Kernel
# ---------------------------------------------------------------------------
def convnet_kernel(x_ref, p_ref, o_ref):
    # x_ref : (CW, BATCH_TILE)  activations, batch on the lane axis
    # p_ref : (PARAM_ROWS, PARAM_COLS) packed weights/biases (resident across the whole grid)
    x = x_ref[...]

    # Conv1d for BOTH MaxPool offsets in ONE MXU matmul (im2col folded into the weight matrix).
    cand = jnp.dot(p_ref[M_OFF:M_OFF + M_ROWS, :], x,
                   preferred_element_type=jnp.float32)                       # (2*FLAT, BT)

    # MaxPool1d(kernel=2) == elementwise max of the two pool-offset halves; conv-bias add and ReLU
    # commute with that max, so they are applied once afterwards on the VPU.
    pooled = jnp.maximum(cand[0:FLAT, :], cand[FLAT:2 * FLAT, :])
    pooled = jnp.maximum(pooled + p_ref[BC_OFF:BC_OFF + FLAT, 0:1], 0.0)      # (FLAT, BT)

    # TODO(synk): nn.Dropout(p=0.5) is treated as inference-mode identity (deterministic forward).

    # fc1 + ReLU  (flatten is implicit: pooled row index == f*POOL_OUT + j == PyTorch .view order)
    y1 = jnp.dot(p_ref[W1_OFF:W1_OFF + H1, 0:FLAT], pooled,
                 preferred_element_type=jnp.float32) + p_ref[B1_OFF:B1_OFF + H1, 0:1]
    y1 = jnp.maximum(y1, 0.0)                                                 # (H1, BT)

    # fc2 + ReLU
    y2 = jnp.dot(p_ref[W2_OFF:W2_OFF + H2, 0:H1], y1,
                 preferred_element_type=jnp.float32) + p_ref[B2_OFF:B2_OFF + H2, 0:1]
    y2 = jnp.maximum(y2, 0.0)                                                 # (H2, BT)

    # fc3 -> lane-dense (1, BT) output tile
    o_ref[...] = (jnp.dot(p_ref[W3_OFF:W3_OFF + 1, 0:H2], y2,
                          preferred_element_type=jnp.float32)
                  + p_ref[B3_OFF:B3_OFF + 1, 0:1])


# ---------------------------------------------------------------------------
# One-time parameter packing (hoisted out of the per-call path)
# ---------------------------------------------------------------------------
def _build_conv_matrix(w_conv):
    """M[p*FLAT + f*POOL_OUT + j, c*WIDTH + (j*POOL_SIZE + p) + k] = w_conv[f, c, k]."""
    wc = np.asarray(w_conv, dtype=np.float32)
    M = np.zeros((M_ROWS, CW), dtype=np.float32)
    for p in range(POOL_SIZE):
        for f in range(NUM_FILTERS):
            for j in range(POOL_OUT):
                row = p * FLAT + f * POOL_OUT + j
                t = j * POOL_SIZE + p                       # conv output time position
                for c in range(IN_CHANNELS):
                    M[row, c * WIDTH + t: c * WIDTH + t + FILTER_SIZE] = wc[f, c]
    return M


def prepare_params(params):
    """Pack all weights/biases into a single (PARAM_ROWS, PARAM_COLS) f32 slab (one DMA)."""
    w_conv, b_conv, W1, b1, W2, b2, W3, b3 = (np.asarray(p, np.float32) for p in params)
    slab = np.zeros((PARAM_ROWS, PARAM_COLS), np.float32)
    slab[M_OFF:M_OFF + M_ROWS, :CW] = _build_conv_matrix(w_conv)
    slab[W1_OFF:W1_OFF + H1, :FLAT] = W1
    slab[W2_OFF:W2_OFF + H2, :H1] = W2
    slab[W3_OFF:W3_OFF + 1, :H2] = W3
    slab[BC_OFF:BC_OFF + FLAT, 0] = np.repeat(b_conv, POOL_OUT)
    slab[B1_OFF:B1_OFF + H1, 0] = b1
    slab[B2_OFF:B2_OFF + H2, 0] = b2
    slab[B3_OFF, 0] = b3[0]
    return jnp.asarray(slab)


# ---------------------------------------------------------------------------
# Forward wrappers
# ---------------------------------------------------------------------------
@jax.jit
def convnet_forward_batched(x_batch, param_slab):
    """x_batch: (B, IN_CHANNELS, WIDTH) -> (B,) scalar outputs (batch on the lane axis)."""
    B = x_batch.shape[0]
    bp = pl.cdiv(B, BATCH_TILE) * BATCH_TILE
    # (B, C, W) -> (C*W, B): lane-dense activations, batch last.
    xt = jnp.transpose(x_batch.astype(jnp.float32), (1, 2, 0)).reshape(CW, B)
    xt = jnp.pad(xt, ((0, 0), (0, bp - B)))

    out = pl.pallas_call(
        convnet_kernel,
        out_shape=jax.ShapeDtypeStruct((1, bp), jnp.float32),
        grid_spec=pltpu.PrefetchScalarGridSpec(
            num_scalar_prefetch=0,
            grid=(bp // BATCH_TILE,),
            in_specs=[
                pl.BlockSpec((CW, BATCH_TILE), lambda i: (0, i)),          # per-tile activations
                pl.BlockSpec((PARAM_ROWS, PARAM_COLS), lambda i: (0, 0)),  # params stay resident
            ],
            out_specs=pl.BlockSpec((1, BATCH_TILE), lambda i: (0, i)),     # lane-dense output
        ),
        compiler_params=pltpu.CompilerParams(
            dimension_semantics=("parallel",)),   # independent batch tiles (megacore on v7x)
    )(xt, param_slab)
    return out[0, :B]


def convnet_forward(x, param_slab):
    """Module-faithful forward: x (IN_CHANNELS, WIDTH) -> (1,), like the PyTorch module."""
    return convnet_forward_batched(x[None], param_slab)


# ---------------------------------------------------------------------------
# Init + pure-JAX reference
# ---------------------------------------------------------------------------
def init_params(key):
    # deterministic PyTorch-style uniform(-1/sqrt(fan_in), 1/sqrt(fan_in)) init
    ks = jax.random.split(key, 8)

    def u(k, shape, fan_in):
        bound = 1.0 / math.sqrt(fan_in)
        return jax.random.uniform(k, shape, jnp.float32, -bound, bound)

    w_conv = u(ks[0], (NUM_FILTERS, IN_CHANNELS, FILTER_SIZE), IN_CHANNELS * FILTER_SIZE)
    b_conv = u(ks[1], (NUM_FILTERS,), IN_CHANNELS * FILTER_SIZE)
    W1 = u(ks[2], (H1, FLAT), FLAT)
    b1 = u(ks[3], (H1,), FLAT)
    W2 = u(ks[4], (H2, H1), H1)
    b2 = u(ks[5], (H2,), H1)
    W3 = u(ks[6], (1, H2), H2)
    b3 = u(ks[7], (1,), H2)
    return (w_conv, b_conv, W1, b1, W2, b2, W3, b3)


def ref_forward(x, params):
    # pure-JAX reference of the PyTorch forward (dropout = identity)
    w_conv, b_conv, W1, b1, W2, b2, W3, b3 = params
    cols = [jax.lax.dynamic_slice(x, (0, t), (IN_CHANNELS, FILTER_SIZE))
            for t in range(CONV_LEN)]
    conv = jnp.stack([jnp.tensordot(w_conv, c, axes=[[1, 2], [0, 1]]) for c in cols],
                     axis=-1) + b_conv[:, None]
    conv = jnp.maximum(conv, 0.0)
    pooled = conv[:, :POOL_OUT * POOL_SIZE].reshape(NUM_FILTERS, POOL_OUT, POOL_SIZE).max(-1)
    flat = pooled.reshape(-1)
    y1 = jnp.maximum(W1 @ flat + b1, 0.0)
    y2 = jnp.maximum(W2 @ y1 + b2, 0.0)
    return W3 @ y2 + b3


if __name__ == "__main__":
    key = jax.random.PRNGKey(0)
    kx, kb, kp = jax.random.split(key, 3)
    params = init_params(kp)
    param_slab = prepare_params(params)          # one-time packing, hoisted out of the forward path

    # 1) module-faithful unbatched forward: (5, 16) -> (1,)
    x = jax.random.normal(kx, (IN_CHANNELS, WIDTH), jnp.float32)
    out1 = jax.block_until_ready(convnet_forward(x, param_slab))
    ref1 = jax.block_until_ready(ref_forward(x, params))
    assert out1.shape == (1,), out1.shape
    assert np.allclose(np.asarray(out1), np.asarray(ref1), rtol=1e-3, atol=1e-3), (out1, ref1)

    # 2) small batch (lane-dense) and a >1-tile batch to exercise the 'parallel' grid axis
    for B in (4, 200):
        xb = jax.random.normal(jax.random.fold_in(kb, B),
                               (B, IN_CHANNELS, WIDTH), jnp.float32)
        outb = jax.block_until_ready(convnet_forward_batched(xb, param_slab))
        refb = jax.block_until_ready(jax.vmap(lambda s: ref_forward(s, params))(xb))
        assert outb.shape == (B,), outb.shape
        assert np.allclose(np.asarray(outb), np.asarray(refb)[:, 0],
                           rtol=1e-3, atol=1e-3), (B, outb[:4], refb[:4, 0])

    print("KERNEL_OK")
</pallas_src>

<mosaic_0001>
module attributes {stable_mosaic.version = 11 : i64} {
  func.func @convnet_kernel(%arg0: i32, %arg1: memref<80x128xf32, #tpu.memory_space<vmem>>, %arg2: memref<256x80xf32, #tpu.memory_space<vmem>>, %arg3: memref<1x128xf32, #tpu.memory_space<vmem>>) attributes {dimension_semantics = [#tpu.dimension_semantics<parallel>], iteration_bounds = array<i64: 1>, scalar_prefetch = 0 : i64, scratch_operands = 0 : i64, tpu.core_type = #tpu.core_type<tc>, window_params = [{transform_indices = @transform_0, window_bounds = array<i64: 80, 128>}, {pipeline_mode = #tpu.pipeline_mode<synchronous>, transform_indices = @transform_1, window_bounds = array<i64: 256, 80>}, {transform_indices = @transform_2, window_bounds = array<i64: 1, 128>}]} {
    %c0 = arith.constant 0 : index
    %c0_0 = arith.constant 0 : index
    %0 = vector.load %arg1[%c0, %c0_0] : memref<80x128xf32, #tpu.memory_space<vmem>>, vector<80x128xf32>
    %c0_1 = arith.constant 0 : index
    %c0_2 = arith.constant 0 : index
    %1 = vector.load %arg2[%c0_1, %c0_2] : memref<256x80xf32, #tpu.memory_space<vmem>>, vector<96x80xf32>
    %cst = arith.constant dense<0.000000e+00> : vector<96x128xf32>
    %2 = tpu.matmul %1, %0, %cst {dimension_numbers = #tpu.dot_dimension_numbers<[1], [0], [0], [1], [0, 0, 1, 1], [], []>} : vector<96x80xf32>, vector<80x128xf32>, vector<96x128xf32> -> vector<96x128xf32>
    %3 = vector.extract_strided_slice %2 {offsets = [0, 0], sizes = [48, 128], strides = [1, 1]} : vector<96x128xf32> to vector<48x128xf32>
    %4 = vector.extract_strided_slice %2 {offsets = [48, 0], sizes = [48, 128], strides = [1, 1]} : vector<96x128xf32> to vector<48x128xf32>
    %5 = arith.maximumf %3, %4 : vector<48x128xf32>
    %c152 = arith.constant 152 : index
    %c0_3 = arith.constant 0 : index
    %6 = vector.load %arg2[%c152, %c0_3] : memref<256x80xf32, #tpu.memory_space<vmem>>, vector<48x1xf32>
    %7 = vector.broadcast %6 : vector<48x1xf32> to vector<48x128xf32>
    %8 = arith.addf %5, %7 : vector<48x128xf32>
    %cst_4 = arith.constant 0.000000e+00 : f32
    %9 = vector.broadcast %cst_4 : f32 to vector<48x128xf32>
    %10 = arith.maximumf %8, %9 : vector<48x128xf32>
    %c96 = arith.constant 96 : index
    %c0_5 = arith.constant 0 : index
    %11 = vector.load %arg2[%c96, %c0_5] : memref<256x80xf32, #tpu.memory_space<vmem>>, vector<32x48xf32>
    %cst_6 = arith.constant dense<0.000000e+00> : vector<32x128xf32>
    %12 = tpu.matmul %11, %10, %cst_6 {dimension_numbers = #tpu.dot_dimension_numbers<[1], [0], [0], [1], [0, 0, 1, 1], [], []>} : vector<32x48xf32>, vector<48x128xf32>, vector<32x128xf32> -> vector<32x128xf32>
    %c200 = arith.constant 200 : index
    %c0_7 = arith.constant 0 : index
    %13 = vector.load %arg2[%c200, %c0_7] : memref<256x80xf32, #tpu.memory_space<vmem>>, vector<32x1xf32>
    %14 = vector.broadcast %13 : vector<32x1xf32> to vector<32x128xf32>
    %15 = arith.addf %12, %14 : vector<32x128xf32>
    %cst_8 = arith.constant 0.000000e+00 : f32
    %16 = vector.broadcast %cst_8 : f32 to vector<32x128xf32>
    %17 = arith.maximumf %15, %16 : vector<32x128xf32>
    %c128 = arith.constant 128 : index
    %c0_9 = arith.constant 0 : index
    %18 = vector.load %arg2[%c128, %c0_9] : memref<256x80xf32, #tpu.memory_space<vmem>>, vector<16x32xf32>
    %cst_10 = arith.constant dense<0.000000e+00> : vector<16x128xf32>
    %19 = tpu.matmul %18, %17, %cst_10 {dimension_numbers = #tpu.dot_dimension_numbers<[1], [0], [0], [1], [0, 0, 1, 1], [], []>} : vector<16x32xf32>, vector<32x128xf32>, vector<16x128xf32> -> vector<16x128xf32>
    %c232 = arith.constant 232 : index
    %c0_11 = arith.constant 0 : index
    %20 = vector.load %arg2[%c232, %c0_11] : memref<256x80xf32, #tpu.memory_space<vmem>>, vector<16x1xf32>
    %21 = vector.broadcast %20 : vector<16x1xf32> to vector<16x128xf32>
    %22 = arith.addf %19, %21 : vector<16x128xf32>
    %cst_12 = arith.constant 0.000000e+00 : f32
    %23 = vector.broadcast %cst_12 : f32 to vector<16x128xf32>
    %24 = arith.maximumf %22, %23 : vector<16x128xf32>
    %c144 = arith.constant 144 : index
    %c0_13 = arith.constant 0 : index
    %25 = vector.load %arg2[%c144, %c0_13] : memref<256x80xf32, #tpu.memory_space<vmem>>, vector<1x16xf32>
    %cst_14 = arith.constant dense<0.000000e+00> : vector<1x128xf32>
    %26 = tpu.matmul %25, %24, %cst_14 {dimension_numbers = #tpu.dot_dimension_numbers<[1], [0], [0], [1], [0, 0, 1, 1], [], []>} : vector<1x16xf32>, vector<16x128xf32>, vector<1x128xf32> -> vector<1x128xf32>
    %c248 = arith.constant 248 : index
    %c0_15 = arith.constant 0 : index
    %27 = vector.load %arg2[%c248, %c0_15] : memref<256x80xf32, #tpu.memory_space<vmem>>, vector<1x1xf32>
    %28 = vector.broadcast %27 : vector<1x1xf32> to vector<1x128xf32>
    %29 = arith.addf %26, %28 : vector<1x128xf32>
    %c0_16 = arith.constant 0 : index
    %c0_17 = arith.constant 0 : index
    %30 = vector.load %arg3[%c0_16, %c0_17] : memref<1x128xf32, #tpu.memory_space<vmem>>, vector<1x128xf32>
    tpu.vector_store %arg3[%c0_16, %c0_17], %29 {strides = array<i32>} : memref<1x128xf32, #tpu.memory_space<vmem>>, vector<1x128xf32>,
    return
  }
  func.func @transform_0(%arg0: i32) -> (i32, i32) {
    %c0_i32 = arith.constant 0 : i32
    %c0_i32_0 = arith.constant 0 : i32
    return %c0_i32, %arg0 : i32, i32
  }
  func.func @transform_1(%arg0: i32) -> (i32, i32) {
    %c0_i32 = arith.constant 0 : i32
    %c0_i32_0 = arith.constant 0 : i32
    %c0_i32_1 = arith.constant 0 : i32
    return %c0_i32, %c0_i32_0 : i32, i32
  }
  func.func @transform_2(%arg0: i32) -> (i32, i32) {
    %c0_i32 = arith.constant 0 : i32
    %c0_i32_0 = arith.constant 0 : i32
    return %c0_i32, %arg0 : i32, i32
  }
}

</mosaic_0001>

<bundles_post_ra>
// kernel: convnet_forward_batched.1
= control target key start
LH: loop header
LB: loop body
LE: loop exit
PB: predicated region body
PF: predicated region fallthrough
CT: control target
= control target key end

     0   :  { %v416_v3 = vmov 0   ;;  %s574_s0 = inlined_call_operand.vmem [shape: f32[80,128], index: 0, kind: input, shape index: {}]   ;;  %s575_s1 = inlined_call_operand.vmem [shape: f32[256,80], index: 1, kind: input, shape index: {}]   ;;  %s576_s2 = inlined_call_operand.hbm [shape: f32[1,128], index: 2, kind: output, shape index: {}]  }
   0x1   :  { %v21_v0 = vld [vmem:[%s574_s0 + $0x48] sm:$0xff]  ;;  %v20_v1 = vld [vmem:[%s574_s0 + $0x40] sm:$0xff]  ;;  %v19_v2 = vld [vmem:[%s574_s0 + $0x38] sm:$0xff]  ;;  %387 = vset.pattern.permute.xlu0 %v416_v3  ;;  %388 = vset.pattern.permute.xlu1 %v416_v3 }
   0x2   :  { %77 = vmatpush.msra.mxu0 %v21_v0  ;;  %365 = vmatpush.msra.mxu2 %v21_v0  ;;  %v18_v4 = vld [vmem:[%s574_s0 + $0x30] sm:$0xff]  ;;  %v135_v5 = vld [vmem:[%s575_s1 + $0xc0] sm:$0xff]  ;;  %v17_v6 = vld [vmem:[%s574_s0 + $0x28] sm:$0xff] }
   0x3   :  { %366 = vmatpush.msra.mxu3 %v21_v0  ;;  %163 = vperm.xlu0 %387, %v135_v5   ;;  %v133_v7 = vld [vmem:[%s575_s1 + $0xb0] sm:$0xff]  ;;  %v16_v8 = vld [vmem:[%s574_s0 + $0x20] sm:$0xff] }
   0x4   :  { %78 = vmatpush.msra.mxu0 %v20_v1  ;;  %367 = vmatpush.msra.mxu2 %v20_v1 }
   0x5   :  { %368 = vmatpush.msra.mxu3 %v20_v1  ;;  %153 = vperm.xlu1 %388, %v133_v7  }
   0x6   :  { %79 = vmatpush.msra.mxu0 %v19_v2  ;;  %369 = vmatpush.msra.mxu2 %v19_v2 }
   0x7   :  { %370 = vmatpush.msra.mxu3 %v19_v2 }
   0x8   :  { %80 = vmatpush.msra.mxu0 %v18_v4  ;;  %371 = vmatpush.msra.mxu2 %v18_v4 }
   0x9   :  { %372 = vmatpush.msra.mxu3 %v18_v4 }
   0xa   :  { %7 = vsyncpa [#allocation3], 0  ;;  %81 = vmatpush.msra.mxu0 %v17_v6  ;;  %373 = vmatpush.msra.mxu2 %v17_v6  ;;  %v15_v9 = vld [vmem:[%s574_s0 + $0x18] sm:$0xff]  ;;  %v14_v11 = vld [vmem:[%s574_s0 + $0x10] sm:$0xff]  ;;  %vm34_vm0 = vcmask 654336   ;;  %vm206_vm1 = vcmask 392192  }
   0xb   :  { %374 = vmatpush.msra.mxu3 %v17_v6  ;;  %389 = vset.pattern.permute.xlu2 %v416_v3  ;;  %v134_v10 = vld [vmem:[%s575_s1 + $0xb8] sm:$0xff]  ;;  %v132_v12 = vld [vmem:[%s575_s1 + $0xa8] sm:$0xff]  ;;  %v12_v14 = vld [vmem:[%s574_s0] sm:$0xff]  ;;  %vm266_vm2 = vcmask 261120   ;;  %vm305_vm3 = vcmask 130048   ;;  %s417_s7 = smov [#allocation2]  }
   0xc   :  { %82 = vmatpush.msra.mxu0 %v16_v8  ;;  %375 = vmatpush.msra.mxu2 %v16_v8  ;;  %v13_v13 = vld [vmem:[%s574_s0 + $0x8] sm:$0xff]  ;;  %v22_v15 = vld [vmem:[%s575_s1] sm:$0xff]  ;;  %v184_v19 = vld [vmem:[%s575_s1 + $0xd8] sm:$0xff]  ;;  %s335_s8 = sshll.u32 %s417_s7, 4  ;;  %s337_s11 = sshll.u32 %s576_s2, 4  ;;  %s336_s8 = int_to_ptr.vmem [resolvable:$true] %s335_s8  ;;  %s338_s11 = int_to_ptr.hbm [resolvable:$true] %s337_s11 }
   0xd   :  { %376 = vmatpush.msra.mxu3 %v16_v8  ;;  %158 = vperm.xlu0 %387, %v134_v10   ;;  %v27_v16 = vld [vmem:[%s575_s1 + $0x28] sm:$0xff]  ;;  %v30_v17 = vld [vmem:[%s575_s1 + $0x40] sm:$0xff]  ;;  %v28_v22 = vld [vmem:[%s575_s1 + $0x30] sm:$0xff] }
   0xe   :  { %83 = vmatpush.msra.mxu0 %v15_v9  ;;  %377 = vmatpush.msra.mxu2 %v15_v9  ;;  %v185_v18 = vld [vmem:[%s575_s1 + $0xe0] sm:$0xff]  ;;  %v23_v21 = vld [vmem:[%s575_s1 + $0x8] sm:$0xff]  ;;  %v130_v25 = vld [vmem:[%s575_s1 + $0x98] sm:$0xff] }
   0xf   :  { %378 = vmatpush.msra.mxu3 %v15_v9  ;;  %148 = vperm.xlu1 %388, %v132_v12   ;;  %v131_v20 = vld [vmem:[%s575_s1 + $0xa0] sm:$0xff]  ;;  %v31_v23 = vld [vmem:[%s575_s1 + $0x48] sm:$0xff]  ;;  %v255_v26 = vld [vmem:[%s575_s1 + $0xf0] sm:$0xff] }
  0x10   :  { %84 = vmatpush.msra.mxu0 %v14_v11  ;;  %379 = vmatpush.msra.mxu2 %v14_v11  ;;  %v182_v24 = vld [vmem:[%s575_s1 + $0xc8] sm:$0xff]  ;;  %v24_v27 = vld [vmem:[%s575_s1 + $0x10] sm:$0xff]  ;;  %v29_v28 = vld [vmem:[%s575_s1 + $0x38] sm:$0xff] }
  0x11   :  { %380 = vmatpush.msra.mxu3 %v14_v11  ;;  %143 = vperm.xlu2 %389, %v131_v20   ;;  %v32_v29 = vld [vmem:[%s575_s1 + $0x50] sm:$0xff]  ;;  %v299_v30 = vld [vmem:[%s575_s1 + $0xf8] sm:$0x1]  ;;  %v254_v34 = vld [vmem:[%s575_s1 + $0xe8] sm:$0xff] }
  0x12   :  { %85 = vmatpush.msra.mxu0 %v13_v13  ;;  %381 = vmatpush.msra.mxu2 %v13_v13  ;;  %v183_v31 = vld [vmem:[%s575_s1 + $0xd0] sm:$0xff]  ;;  %v25_v32 = vld [vmem:[%s575_s1 + $0x18] sm:$0xff]  ;;  %v26_v35 = vld [vmem:[%s575_s1 + $0x20] sm:$0xff] }
  0x13   :  { %382 = vmatpush.msra.mxu3 %v13_v13  ;;  %v33_v33 = vld [vmem:[%s575_s1 + $0x58] sm:$0xff]  ;;  %v178_v8 = vld [vmem:[%s575_s1 + $0x60] sm:$0xff]  ;;  %v179_v9 = vld [vmem:[%s575_s1 + $0x68] sm:$0xff] }
  0x14   :  { %86 = vmatpush.msra.mxu0 %v12_v14  ;;  %383 = vmatpush.msra.mxu2 %v12_v14  ;;  %v180_v10 = vld [vmem:[%s575_s1 + $0x70] sm:$0xff]  ;;  %v181_v11 = vld [vmem:[%s575_s1 + $0x78] sm:$0xff] }
  0x15   :  { %384 = vmatpush.msra.mxu3 %v12_v14  ;;  %346 = vmatmul.msk.f32.vlgmr.msra.gmra.mxu0 %vm34_vm0, %v22_v15 }
  0x16   :  { %351 = vmatmul.msk.f32.vlgmr.msra.gmra.mxu2 %vm34_vm0, %v27_v16  ;;  %354 = vmatmul.msk.f32.vlgmr.msra.gmra.mxu3 %vm34_vm0, %v30_v17 }
  0x17   :  { %203 = vperm.xlu0 %387, %v185_v18   ;;  %198 = vperm.xlu1 %388, %v184_v19  }
  0x19   :  { %138 = vperm.xlu2 %389, %v130_v25  }
  0x1d   :  { %347 = vmatmul.msk.f32.gmra.mxu0 %vm34_vm0, %v23_v21 }
  0x1e   :  { %352 = vmatmul.msk.f32.gmra.mxu2 %vm34_vm0, %v28_v22  ;;  %355 = vmatmul.msk.f32.gmra.mxu3 %vm34_vm0, %v31_v23 }
  0x1f   :  { %188 = vperm.xlu0 %387, %v182_v24   ;;  %263 = vperm.xlu1 %388, %v255_v26  }
  0x21   :  { %193 = vperm.xlu2 %389, %v183_v31  }
  0x25   :  { %348 = vmatmul.msk.f32.gmra.mxu0 %vm34_vm0, %v24_v27 }
  0x26   :  { %353 = vmatmul.msk.f32.gmra.mxu2 %vm34_vm0, %v29_v28  ;;  %356 = vmatmul.msk.f32.gmra.mxu3 %vm34_vm0, %v32_v29  ;;  %v252_v28 = vld [vmem:[%s575_s1 + $0x80] sm:$0xff]  ;;  %v253_v29 = vld [vmem:[%s575_s1 + $0x88] sm:$0xff] }
  0x27   :  { %302 = vperm.xlu0 %387, %v299_v30  }
  0x29   :  { %258 = vperm.xlu2 %389, %v254_v34  }
  0x2d   :  { %349 = vmatmul.msk.f32.gmra.mxu0 %vm34_vm0, %v25_v32 }
  0x2e   :  { %357 = vmatmul.msk.f32.gmra.mxu3 %vm34_vm0, %v33_v33 }
  0x35   :  { %350 = vmatmul.msk.f32.gmra.mxu0 %vm34_vm0, %v26_v35 }
  0x6b   :  { %v144_v47 = vpop.permute.xlu2 %143 }
  0x73   :  { %v139_v1 = vpop.permute.xlu2 %138 }
  0x75   :  { %v164_v44 = vpop.permute.xlu0 %163 }
  0x77   :  { %v154_v46 = vpop.permute.xlu1 %153 }
  0x7b   :  { %v194_v20 = vpop.permute.xlu2 %193 }
  0x7f   :  { %v159_v54 = vpop.permute.xlu0 %158 }
  0x81   :  { %v149_v61 = vpop.permute.xlu1 %148 }
  0x83   :  { %v259_v32 = vpop.permute.xlu2 %258 }
  0x89   :  { %v204_v15 = vpop.permute.xlu0 %203  ;;  %v199_v16 = vpop.permute.xlu1 %198 }
  0x91   :  { %v189_v23 = vpop.permute.xlu0 %188  ;;  %v264_v31 = vpop.permute.xlu1 %263 }
  0x92   :  { %v88_v36 = vpop.f32.mrf.mxu0 }
  0x99   :  { %v112_v37 = vpop.f32.mrf.mxu3  ;;  %v103_v39 = vpop.f32.mrf.mxu2 }
  0x9a   :  { %v91_v38 = vpop.f32.mrf.mxu0 }
  0xa1   :  { %v115_v40 = vpop.f32.mrf.mxu3  ;;  %v106_v42 = vpop.f32.mrf.mxu2 }
  0xa2   :  { %v94_v41 = vpop.f32.mrf.mxu0  ;;  %v124_v63 = vmax.f32 %v88_v36, %v106_v42 }
  0xa3   :  { %v126_v55 = vmax.f32 %v94_v41, %v112_v37 }
  0xa4   :  { %v166_v4 = vadd.f32 %v139_v1, %v124_v63 }
  0xa5   :  { %v168_v0 = vadd.f32 %v149_v61, %v126_v55 }
  0xa6   :  { %v172_v7 = vmax.f32 %v166_v4, 0.0 }
  0xa7   :  { %v174_v5 = vmax.f32 %v168_v0, 0.0 }
  0xa9   :  { %v118_v43 = vpop.f32.mrf.mxu3  ;;  %v109_v52 = vpop.f32.mrf.mxu2 }
  0xaa   :  { %v97_v45 = vpop.f32.mrf.mxu0  ;;  %v125_v58 = vmax.f32 %v91_v38, %v109_v52  ;;  %v298_v38 = vld [vmem:[%s575_s1 + $0x90] sm:$0x1] }
  0xab   :  { %v127_v49 = vmax.f32 %v97_v45, %v115_v40 }
  0xac   :  { %v167_v3 = vadd.f32 %v144_v47, %v125_v58 }
  0xad   :  { %v169_v60 = vadd.f32 %v154_v46, %v127_v49 }
  0xae   :  { %v173_v6 = vmax.f32 %v167_v3, 0.0 }
  0xaf   :  { %v175_v2 = vmax.f32 %v169_v60, 0.0 }
  0xb1   :  { %v121_v48 = vpop.f32.mrf.mxu3 }
  0xb2   :  { %v129_v50 = vmax.f32 %v103_v39, %v121_v48  ;;  %v100_v51 = vpop.f32.mrf.mxu0  ;;  %v303_v39 = vpop.permute.xlu0 %302 }
  0xb3   :  { %v128_v53 = vmax.f32 %v100_v51, %v118_v43 }
  0xb4   :  { %v171_v56 = vadd.f32 %v164_v44, %v129_v50 }
  0xb5   :  { %v170_v57 = vadd.f32 %v159_v54, %v128_v53 }
  0xb6   :  { %v177_v59 = vmax.f32 %v171_v56, 0.0 }
  0xb7   :  { %v176_v62 = vmax.f32 %v170_v57, 0.0 }
  0xb8   :  { %229 = vmatpush.msra.mxu1 %v177_v59 }
  0xba   :  { %230 = vmatpush.msra.mxu1 %v176_v62 }
  0xbc   :  { %231 = vmatpush.msra.mxu1 %v175_v2 }
  0xbe   :  { %232 = vmatpush.msra.mxu1 %v174_v5 }
  0xc0   :  { %233 = vmatpush.msra.mxu1 %v173_v6 }
  0xc2   :  { %234 = vmatpush.msra.mxu1 %v172_v7 }
  0xc3   :  { %358 = vmatmul.msk.f32.vlgmr.msra.gmra.mxu1 %vm206_vm1, %v178_v8 }
  0xcb   :  { %359 = vmatmul.msk.f32.gmra.mxu1 %vm206_vm1, %v179_v9 }
  0xd3   :  { %360 = vmatmul.msk.f32.gmra.mxu1 %vm206_vm1, %v180_v10 }
  0xdb   :  { %361 = vmatmul.msk.f32.gmra.mxu1 %vm206_vm1, %v181_v11 }
 0x140   :  { %v236_v12 = vpop.f32.mrf.mxu1 }
 0x141   :  { %v237_v24 = vadd.f32 %v236_v12, %v189_v23 }
 0x143   :  { %v248_v27 = vmax.f32 %v237_v24, 0.0 }
 0x148   :  { %v239_v13 = vpop.f32.mrf.mxu1 }
 0x149   :  { %v240_v21 = vadd.f32 %v239_v13, %v194_v20 }
 0x14b   :  { %v249_v26 = vmax.f32 %v240_v21, 0.0 }
 0x150   :  { %v242_v14 = vpop.f32.mrf.mxu1 }
 0x151   :  { %v243_v18 = vadd.f32 %v242_v14, %v199_v16 }
 0x153   :  { %v250_v25 = vmax.f32 %v243_v18, 0.0 }
 0x158   :  { %v245_v17 = vpop.f32.mrf.mxu1 }
 0x159   :  { %v246_v19 = vadd.f32 %v245_v17, %v204_v15 }
 0x15b   :  { %v251_v22 = vmax.f32 %v246_v19, 0.0 }
 0x15d   :  { %285 = vmatpush.msrb.mxu2 %v251_v22 }
 0x15f   :  { %286 = vmatpush.msrb.mxu2 %v250_v25 }
 0x161   :  { %287 = vmatpush.msrb.mxu2 %v249_v26 }
 0x163   :  { %288 = vmatpush.msrb.mxu2 %v248_v27 }
 0x164   :  { %362 = vmatmul.msk.f32.vlgmr.msrb.gmra.mxu2 %vm266_vm2, %v252_v28 }
 0x16c   :  { %363 = vmatmul.msk.f32.gmra.mxu2 %vm266_vm2, %v253_v29 }
 0x1e7   :  { %v290_v30 = vpop.f32.mrf.mxu2 }
 0x1e8   :  { %v291_v34 = vadd.f32 %v290_v30, %v259_v32 }
 0x1ea   :  { %v296_v37 = vmax.f32 %v291_v34, 0.0 }
 0x1ef   :  { %v293_v33 = vpop.f32.mrf.mxu2 }
 0x1f0   :  { %v294_v35 = vadd.f32 %v293_v33, %v264_v31 }
 0x1f2   :  { %v297_v36 = vmax.f32 %v294_v35, 0.0 }
 0x1f4   :  { %323 = vmatpush.msrb.mxu3 %v297_v36 }
 0x1f6   :  { %324 = vmatpush.msrb.mxu3 %v296_v37 }
 0x1f7   :  { %364 = vmatmul.msk.f32.vlgmr.msrb.gmra.mxu3 %vm305_vm3, %v298_v38 }
 0x27a   :  { %v326_v40 = vpop.f32.mrf.mxu3 }
 0x27b   :  { %v327_v41 = vadd.f32 %v326_v40, %v303_v39 }
 0x27d   :  { %329 = vst [vmem:[#allocation2] sm:$0x1] %v327_v41 }
 0x27e   :  { %340 = dma.vmem_to_hbm [thread:$0]  %s336_s8, 16, %s338_s11, [#allocation3]  }
 0x27f   :  { %414 = dma.done.wait [#allocation3], 16  }
 0x280   :  { %415 = vsyncadd [#allocation3], 4294967280 }
 0x281   :  { %345 = vsyncpa [#allocation3], 1 }

</bundles_post_ra>
